<compile_context>
chip_gen: v7x
topology: tpu7x:2x2x1
jax: 0.10.0
libtpu: 0.0.40
codegen_flags: <defaults>
</compile_context>

<pallas_src>
import functools

import jax
import jax.numpy as jnp
from jax import lax
from jax.experimental import pallas as pl
from jax.experimental.pallas import tpu as pltpu


def _round_up(x: int, m: int) -> int:
    return ((x + m - 1) // m) * m


def _fused_mlp_kernel(ids_ref, ftab_ref, b1_ref, w2_ref, b2_ref, out_ref):
    """One batch tile: (folded embedding+Linear1) -> ReLU -> Linear2 -> log_softmax."""
    tm, S = ids_ref.shape              # (tile_batch, num_token_positions)
    K, H = ftab_ref.shape              # K = S * Vp folded table rows
    Vp = K // S                        # lane-aligned vocab width per position

    ids = ids_ref[...]                                     # (tm, S) int32
    col = lax.broadcasted_iota(jnp.int32, (tm, Vp), 1)     # reused across positions

    # hidden = flatten(embed(ids)) @ W1  ==  sum_t onehot_t @ F[t]
    # Per-position one-hot keeps the live vreg set small (no (tm, S*Vp) temps).
    h = jnp.zeros((tm, H), jnp.float32)
    for t in range(S):                                     # S is small & static: unrolled
        onehot_t = (col == ids[:, t:t + 1]).astype(ftab_ref.dtype)   # (tm, Vp), no select
        h = h + jnp.dot(onehot_t, ftab_ref[pl.ds(t * Vp, Vp), :],
                        preferred_element_type=jnp.float32)
    h = jnp.maximum(h + b1_ref[...], 0.0)                  # ReLU, (tm, H) f32

    logits = jnp.dot(h.astype(w2_ref.dtype), w2_ref[...],
                     preferred_element_type=jnp.float32) + b2_ref[...]   # (tm, Op)

    # Numerically-stable log_softmax along dim=1.  Padded logit columns carry a
    # -1e30 bias, so exp() underflows to 0 and they do not perturb the result.
    m = jnp.max(logits, axis=1, keepdims=True)
    shifted = logits - m
    lse = jnp.log(jnp.sum(jnp.exp(shifted), axis=1, keepdims=True))
    out_ref[...] = shifted - lse                           # lane-dense (tm, Op) store


def prepare_dependency_params(emb_table, w1, b1, w2, b2, param_dtype=jnp.float32):
    """One-time weight prep: fold emb@W1 per position, pad to lane widths, cast.

    Call ONCE and reuse the results across forward calls (the fold einsum and
    pads/casts must not sit in the per-step path for realistic vocab sizes).
    Returns (ftab, b1_r, w2_p, b2_p, vocab_size, num_outputs).
    """
    V, E = emb_table.shape
    SE, H = w1.shape
    assert SE % E == 0, "hidden_layer in_features must be a multiple of embedding_dim"
    S = SE // E
    O = w2.shape[1]

    Vp = _round_up(V, 128)             # lane-aligned vocab width per position
    Op = _round_up(O, 128)             # lane-dense output width

    w1_r = w1.astype(jnp.float32).reshape(S, E, H)
    ftab = jnp.einsum("ve,seh->svh", emb_table.astype(jnp.float32), w1_r)   # (S, V, H)
    ftab = jnp.pad(ftab, ((0, 0), (0, Vp - V), (0, 0)))
    ftab = ftab.reshape(S * Vp, H).astype(param_dtype)                      # (S*Vp, H)
    # TODO(synk): for very large vocabularies the folded table exceeds VMEM
    # (64 MiB physical on v7x, 16 MiB scoped default on v5e); that case needs a
    # vocab-tiled grid axis (arbitrary + accumulator) or an in-kernel DMA gather.

    b1_r = b1.reshape(1, H).astype(jnp.float32)
    w2_p = jnp.pad(w2.astype(jnp.float32), ((0, 0), (0, Op - O))).astype(param_dtype)
    b2_p = jnp.pad(b2.reshape(1, O).astype(jnp.float32), ((0, 0), (0, Op - O)),
                   constant_values=-1e30)                                   # (1, Op)
    return ftab, b1_r, w2_p, b2_p, V, O


@functools.partial(jax.jit, static_argnames=("vocab_size", "num_outputs", "block_b"))
def dependency_model_forward(token_ids, ftab, b1_r, w2_p, b2_p, *,
                             vocab_size, num_outputs, block_b=256):
    """token_ids: (B, S) ints.  Returns (B, num_outputs) f32 log-probs."""
    B, S = token_ids.shape
    K, H = ftab.shape
    assert K % S == 0, "folded table rows must be S * padded_vocab"
    Op = w2_p.shape[1]

    # Clamp out-of-range ids (jnp.take-style semantics) instead of silently
    # selecting zero-padded / aliased folded-table rows.
    ids = jnp.clip(token_ids.astype(jnp.int32), 0, vocab_size - 1)

    # ---------------- batch tiling --------------------------------------------
    B8 = _round_up(B, 8)
    tm = min(block_b, B8)                       # tile height (multiple of 8)
    if B8 > 8:
        # Prefer >= 2 grid steps so the "parallel" axis can shard across the
        # two TensorCores on v7x (no effect on v5e/v6e).
        tm = min(tm, _round_up(-(-B8 // 2), 8))
    B_pad = _round_up(B, tm)
    ids = jnp.pad(ids, ((0, B_pad - B), (0, 0)))           # (B_pad, S)

    # VMEM budget: resident weights + double-buffered streamed tiles, with
    # headroom.  Keeps v5e's 16 MiB scoped default from rejecting larger tables.
    resident = sum(int(a.size) * a.dtype.itemsize for a in (ftab, b1_r, w2_p, b2_p))
    streamed = tm * S * 4 + tm * Op * 4
    vmem_limit = min(100 * 1024 * 1024,
                     max(16 * 1024 * 1024, int(2.5 * (resident + 2 * streamed))))

    out = pl.pallas_call(
        _fused_mlp_kernel,
        out_shape=jax.ShapeDtypeStruct((B_pad, Op), jnp.float32),
        grid=(B_pad // tm,),
        in_specs=[
            pl.BlockSpec((tm, S), lambda i: (i, 0)),        # token ids, per batch tile
            pl.BlockSpec((K, H), lambda i: (0, 0)),         # folded emb@W1 (VMEM-resident)
            pl.BlockSpec((1, H), lambda i: (0, 0)),         # b1        (resident)
            pl.BlockSpec((H, Op), lambda i: (0, 0)),        # W2 padded (resident)
            pl.BlockSpec((1, Op), lambda i: (0, 0)),        # b2 padded (resident)
        ],
        out_specs=pl.BlockSpec((tm, Op), lambda i: (i, 0)), # lane-dense output tile
        compiler_params=pltpu.CompilerParams(
            dimension_semantics=("parallel",),              # shards across v7x TCs
            vmem_limit_bytes=vmem_limit),
    )(ids, ftab, b1_r, w2_p, b2_p)

    return out[:B, :num_outputs]


if __name__ == "__main__":
    # Small, deterministic problem sizes consistent with the module
    # (hidden_layer expects 768 = 6 tokens * 128-dim embeddings).
    B = 24            # batch — not a multiple of the tile (tests padding + 2-step grid)
    SEQ = 6
    EMB = 128
    WORD_TYPES = 64
    OUTPUTS = 91

    key = jax.random.PRNGKey(0)
    k_emb, k_w1, k_b1, k_w2, k_b2, k_in = jax.random.split(key, 6)

    emb_table = jax.random.normal(k_emb, (WORD_TYPES, EMB), jnp.float32) * 0.1
    w1 = jax.random.normal(k_w1, (SEQ * EMB, 128), jnp.float32) * 0.05    # (768, 128)
    b1 = jax.random.normal(k_b1, (128,), jnp.float32) * 0.05
    w2 = jax.random.normal(k_w2, (128, OUTPUTS), jnp.float32) * 0.05      # (128, 91)
    b2 = jax.random.normal(k_b2, (OUTPUTS,), jnp.float32) * 0.05

    token_ids = jax.random.randint(k_in, (B, SEQ), 0, WORD_TYPES, jnp.int32)

    # One-time weight prep (hoisted out of the per-call forward path).
    ftab, b1_r, w2_p, b2_p, vocab_size, num_outputs = prepare_dependency_params(
        emb_table, w1, b1, w2, b2, param_dtype=jnp.float32)

    log_probs = dependency_model_forward(token_ids, ftab, b1_r, w2_p, b2_p,
                                         vocab_size=vocab_size,
                                         num_outputs=num_outputs)
    log_probs = jax.block_until_ready(log_probs)

    # Pure-JAX reference with the original module semantics (all f32).
    flat = jnp.take(emb_table, token_ids, axis=0).reshape(B, -1)
    hid = jnp.maximum(flat @ w1 + b1, 0.0)
    ref = jax.nn.log_softmax(hid @ w2 + b2, axis=1)

    row_sums = jnp.exp(log_probs).sum(axis=1)
    assert log_probs.shape == (B, OUTPUTS)
    assert bool(jnp.all(jnp.abs(row_sums - 1.0) < 1e-4))
    assert bool(jnp.max(jnp.abs(log_probs - ref)) < 1e-3)   # f32 weights: tight match

    print("KERNEL_OK")
</pallas_src>

<mosaic_0001>
module attributes {stable_mosaic.version = 11 : i64} {
  func.func @_fused_mlp_kernel(%arg0: i32, %arg1: memref<16x6xi32, #tpu.memory_space<vmem>>, %arg2: memref<768x128xf32, #tpu.memory_space<vmem>>, %arg3: memref<1x128xf32, #tpu.memory_space<vmem>>, %arg4: memref<128x128xf32, #tpu.memory_space<vmem>>, %arg5: memref<1x128xf32, #tpu.memory_space<vmem>>, %arg6: memref<16x128xf32, #tpu.memory_space<vmem>>) attributes {dimension_semantics = [#tpu.dimension_semantics<parallel>], iteration_bounds = array<i64: 2>, scalar_prefetch = 0 : i64, scratch_operands = 0 : i64, tpu.core_type = #tpu.core_type<tc>, window_params = [{transform_indices = @transform_0, window_bounds = array<i64: 16, 6>}, {pipeline_mode = #tpu.pipeline_mode<synchronous>, transform_indices = @transform_1, window_bounds = array<i64: 768, 128>}, {pipeline_mode = #tpu.pipeline_mode<synchronous>, transform_indices = @transform_2, window_bounds = array<i64: 1, 128>}, {pipeline_mode = #tpu.pipeline_mode<synchronous>, transform_indices = @transform_3, window_bounds = array<i64: 128, 128>}, {pipeline_mode = #tpu.pipeline_mode<synchronous>, transform_indices = @transform_4, window_bounds = array<i64: 1, 128>}, {transform_indices = @transform_5, window_bounds = array<i64: 16, 128>}]} {
    %c0 = arith.constant 0 : index
    %c0_0 = arith.constant 0 : index
    %0 = vector.load %arg1[%c0, %c0_0] : memref<16x6xi32, #tpu.memory_space<vmem>>, vector<16x6xi32>
    %1 = tpu.iota {dimensions = array<i32: 1>} : vector<16x128xi32>
    %cst = arith.constant 0.000000e+00 : f32
    %2 = vector.broadcast %cst : f32 to vector<16x128xf32>
    %3 = vector.extract_strided_slice %0 {offsets = [0, 0], sizes = [16, 1], strides = [1, 1]} : vector<16x6xi32> to vector<16x1xi32>
    %4 = vector.broadcast %3 : vector<16x1xi32> to vector<16x128xi32>
    %5 = arith.cmpi eq, %1, %4 : vector<16x128xi32>
    %6 = arith.extui %5 : vector<16x128xi1> to vector<16x128xi32>
    %7 = arith.sitofp %6 : vector<16x128xi32> to vector<16x128xf32>
    %c0_1 = arith.constant 0 : index
    %c0_2 = arith.constant 0 : index
    %8 = vector.load %arg2[%c0_1, %c0_2] : memref<768x128xf32, #tpu.memory_space<vmem>>, vector<128x128xf32>
    %cst_3 = arith.constant dense<0.000000e+00> : vector<16x128xf32>
    %9 = tpu.matmul %7, %8, %cst_3 {dimension_numbers = #tpu.dot_dimension_numbers<[1], [0], [0], [1], [0, 0, 1, 1], [], []>} : vector<16x128xf32>, vector<128x128xf32>, vector<16x128xf32> -> vector<16x128xf32>
    %10 = arith.addf %2, %9 : vector<16x128xf32>
    %11 = vector.extract_strided_slice %0 {offsets = [0, 1], sizes = [16, 1], strides = [1, 1]} : vector<16x6xi32> to vector<16x1xi32>
    %12 = vector.broadcast %11 : vector<16x1xi32> to vector<16x128xi32>
    %13 = arith.cmpi eq, %1, %12 : vector<16x128xi32>
    %14 = arith.extui %13 : vector<16x128xi1> to vector<16x128xi32>
    %15 = arith.sitofp %14 : vector<16x128xi32> to vector<16x128xf32>
    %c128 = arith.constant 128 : index
    %c0_4 = arith.constant 0 : index
    %16 = vector.load %arg2[%c128, %c0_4] : memref<768x128xf32, #tpu.memory_space<vmem>>, vector<128x128xf32>
    %cst_5 = arith.constant dense<0.000000e+00> : vector<16x128xf32>
    %17 = tpu.matmul %15, %16, %cst_5 {dimension_numbers = #tpu.dot_dimension_numbers<[1], [0], [0], [1], [0, 0, 1, 1], [], []>} : vector<16x128xf32>, vector<128x128xf32>, vector<16x128xf32> -> vector<16x128xf32>
    %18 = arith.addf %10, %17 : vector<16x128xf32>
    %19 = vector.extract_strided_slice %0 {offsets = [0, 2], sizes = [16, 1], strides = [1, 1]} : vector<16x6xi32> to vector<16x1xi32>
    %20 = vector.broadcast %19 : vector<16x1xi32> to vector<16x128xi32>
    %21 = arith.cmpi eq, %1, %20 : vector<16x128xi32>
    %22 = arith.extui %21 : vector<16x128xi1> to vector<16x128xi32>
    %23 = arith.sitofp %22 : vector<16x128xi32> to vector<16x128xf32>
    %c256 = arith.constant 256 : index
    %c0_6 = arith.constant 0 : index
    %24 = vector.load %arg2[%c256, %c0_6] : memref<768x128xf32, #tpu.memory_space<vmem>>, vector<128x128xf32>
    %cst_7 = arith.constant dense<0.000000e+00> : vector<16x128xf32>
    %25 = tpu.matmul %23, %24, %cst_7 {dimension_numbers = #tpu.dot_dimension_numbers<[1], [0], [0], [1], [0, 0, 1, 1], [], []>} : vector<16x128xf32>, vector<128x128xf32>, vector<16x128xf32> -> vector<16x128xf32>
    %26 = arith.addf %18, %25 : vector<16x128xf32>
    %27 = vector.extract_strided_slice %0 {offsets = [0, 3], sizes = [16, 1], strides = [1, 1]} : vector<16x6xi32> to vector<16x1xi32>
    %28 = vector.broadcast %27 : vector<16x1xi32> to vector<16x128xi32>
    %29 = arith.cmpi eq, %1, %28 : vector<16x128xi32>
    %30 = arith.extui %29 : vector<16x128xi1> to vector<16x128xi32>
    %31 = arith.sitofp %30 : vector<16x128xi32> to vector<16x128xf32>
    %c384 = arith.constant 384 : index
    %c0_8 = arith.constant 0 : index
    %32 = vector.load %arg2[%c384, %c0_8] : memref<768x128xf32, #tpu.memory_space<vmem>>, vector<128x128xf32>
    %cst_9 = arith.constant dense<0.000000e+00> : vector<16x128xf32>
    %33 = tpu.matmul %31, %32, %cst_9 {dimension_numbers = #tpu.dot_dimension_numbers<[1], [0], [0], [1], [0, 0, 1, 1], [], []>} : vector<16x128xf32>, vector<128x128xf32>, vector<16x128xf32> -> vector<16x128xf32>
    %34 = arith.addf %26, %33 : vector<16x128xf32>
    %35 = vector.extract_strided_slice %0 {offsets = [0, 4], sizes = [16, 1], strides = [1, 1]} : vector<16x6xi32> to vector<16x1xi32>
    %36 = vector.broadcast %35 : vector<16x1xi32> to vector<16x128xi32>
    %37 = arith.cmpi eq, %1, %36 : vector<16x128xi32>
    %38 = arith.extui %37 : vector<16x128xi1> to vector<16x128xi32>
    %39 = arith.sitofp %38 : vector<16x128xi32> to vector<16x128xf32>
    %c512 = arith.constant 512 : index
    %c0_10 = arith.constant 0 : index
    %40 = vector.load %arg2[%c512, %c0_10] : memref<768x128xf32, #tpu.memory_space<vmem>>, vector<128x128xf32>
    %cst_11 = arith.constant dense<0.000000e+00> : vector<16x128xf32>
    %41 = tpu.matmul %39, %40, %cst_11 {dimension_numbers = #tpu.dot_dimension_numbers<[1], [0], [0], [1], [0, 0, 1, 1], [], []>} : vector<16x128xf32>, vector<128x128xf32>, vector<16x128xf32> -> vector<16x128xf32>
    %42 = arith.addf %34, %41 : vector<16x128xf32>
    %43 = vector.extract_strided_slice %0 {offsets = [0, 5], sizes = [16, 1], strides = [1, 1]} : vector<16x6xi32> to vector<16x1xi32>
    %44 = vector.broadcast %43 : vector<16x1xi32> to vector<16x128xi32>
    %45 = arith.cmpi eq, %1, %44 : vector<16x128xi32>
    %46 = arith.extui %45 : vector<16x128xi1> to vector<16x128xi32>
    %47 = arith.sitofp %46 : vector<16x128xi32> to vector<16x128xf32>
    %c640 = arith.constant 640 : index
    %c0_12 = arith.constant 0 : index
    %48 = vector.load %arg2[%c640, %c0_12] : memref<768x128xf32, #tpu.memory_space<vmem>>, vector<128x128xf32>
    %cst_13 = arith.constant dense<0.000000e+00> : vector<16x128xf32>
    %49 = tpu.matmul %47, %48, %cst_13 {dimension_numbers = #tpu.dot_dimension_numbers<[1], [0], [0], [1], [0, 0, 1, 1], [], []>} : vector<16x128xf32>, vector<128x128xf32>, vector<16x128xf32> -> vector<16x128xf32>
    %50 = arith.addf %42, %49 : vector<16x128xf32>
    %c0_14 = arith.constant 0 : index
    %c0_15 = arith.constant 0 : index
    %51 = vector.load %arg3[%c0_14, %c0_15] : memref<1x128xf32, #tpu.memory_space<vmem>>, vector<1x128xf32>
    %52 = vector.broadcast %51 : vector<1x128xf32> to vector<16x128xf32>
    %53 = arith.addf %50, %52 : vector<16x128xf32>
    %cst_16 = arith.constant 0.000000e+00 : f32
    %54 = vector.broadcast %cst_16 : f32 to vector<16x128xf32>
    %55 = arith.maximumf %53, %54 : vector<16x128xf32>
    %c0_17 = arith.constant 0 : index
    %c0_18 = arith.constant 0 : index
    %56 = vector.load %arg4[%c0_17, %c0_18] : memref<128x128xf32, #tpu.memory_space<vmem>>, vector<128x128xf32>
    %cst_19 = arith.constant dense<0.000000e+00> : vector<16x128xf32>
    %57 = tpu.matmul %55, %56, %cst_19 {dimension_numbers = #tpu.dot_dimension_numbers<[1], [0], [0], [1], [0, 0, 1, 1], [], []>} : vector<16x128xf32>, vector<128x128xf32>, vector<16x128xf32> -> vector<16x128xf32>
    %c0_20 = arith.constant 0 : index
    %c0_21 = arith.constant 0 : index
    %58 = vector.load %arg5[%c0_20, %c0_21] : memref<1x128xf32, #tpu.memory_space<vmem>>, vector<1x128xf32>
    %59 = vector.broadcast %58 : vector<1x128xf32> to vector<16x128xf32>
    %60 = arith.addf %57, %59 : vector<16x128xf32>
    %cst_22 = arith.constant dense<0xFF800000> : vector<16xf32>
    %61 = vector.multi_reduction <maximumf>, %60, %cst_22 [1] : vector<16x128xf32> to vector<16xf32>
    %62 = vector.shape_cast %61 : vector<16xf32> to vector<16x1xf32>
    %63 = vector.broadcast %62 : vector<16x1xf32> to vector<16x128xf32>
    %64 = arith.subf %60, %63 : vector<16x128xf32>
    %65 = math.exp %64 : vector<16x128xf32>
    %cst_23 = arith.constant dense<0.000000e+00> : vector<16xf32>
    %66 = vector.multi_reduction <add>, %65, %cst_23 [1] : vector<16x128xf32> to vector<16xf32>
    %67 = vector.shape_cast %66 : vector<16xf32> to vector<16x1xf32>
    %68 = math.log %67 : vector<16x1xf32>
    %69 = vector.broadcast %68 : vector<16x1xf32> to vector<16x128xf32>
    %70 = arith.subf %64, %69 : vector<16x128xf32>
    %c0_24 = arith.constant 0 : index
    %c0_25 = arith.constant 0 : index
    %71 = vector.load %arg6[%c0_24, %c0_25] : memref<16x128xf32, #tpu.memory_space<vmem>>, vector<16x128xf32>
    tpu.vector_store %arg6[%c0_24, %c0_25], %70 {strides = array<i32>} : memref<16x128xf32, #tpu.memory_space<vmem>>, vector<16x128xf32>,
    return
  }
  func.func @transform_0(%arg0: i32) -> (i32, i32) {
    %c0_i32 = arith.constant 0 : i32
    %c0_i32_0 = arith.constant 0 : i32
    return %arg0, %c0_i32 : i32, i32
  }
  func.func @transform_1(%arg0: i32) -> (i32, i32) {
    %c0_i32 = arith.constant 0 : i32
    %c0_i32_0 = arith.constant 0 : i32
    %c0_i32_1 = arith.constant 0 : i32
    return %c0_i32, %c0_i32_0 : i32, i32
  }
  func.func @transform_2(%arg0: i32) -> (i32, i32) {
    %c0_i32 = arith.constant 0 : i32
    %c0_i32_0 = arith.constant 0 : i32
    %c0_i32_1 = arith.constant 0 : i32
    return %c0_i32, %c0_i32_0 : i32, i32
  }
  func.func @transform_3(%arg0: i32) -> (i32, i32) {
    %c0_i32 = arith.constant 0 : i32
    %c0_i32_0 = arith.constant 0 : i32
    %c0_i32_1 = arith.constant 0 : i32
    return %c0_i32, %c0_i32_0 : i32, i32
  }
  func.func @transform_4(%arg0: i32) -> (i32, i32) {
    %c0_i32 = arith.constant 0 : i32
    %c0_i32_0 = arith.constant 0 : i32
    %c0_i32_1 = arith.constant 0 : i32
    return %c0_i32, %c0_i32_0 : i32, i32
  }
  func.func @transform_5(%arg0: i32) -> (i32, i32) {
    %c0_i32 = arith.constant 0 : i32
    %c0_i32_0 = arith.constant 0 : i32
    return %arg0, %c0_i32 : i32, i32
  }
}

</mosaic_0001>

<bundles_post_ra>
// kernel: dependency_model_forward.1
= control target key start
LH: loop header
LB: loop body
LE: loop exit
PB: predicated region body
PF: predicated region fallthrough
CT: control target
= control target key end

     0   :  { %10 = vsyncpa [#allocation3], 0  ;;  %s1842_s18 = smov 0   ;;  %s2010_s0 = inlined_call_operand.vmem [shape: s32[32,6], index: 0, kind: input, shape index: {}]   ;;  %s2011_s1 = inlined_call_operand.hbm [shape: f32[768,128], index: 1, kind: input, shape index: {}]   ;;  %s2012_s2 = inlined_call_operand.vmem [shape: f32[1,128], index: 2, kind: input, shape index: {}]   ;;  %s2013_s3 = inlined_call_operand.vmem [shape: f32[128,128], index: 3, kind: input, shape index: {}]   ;;  %s2014_s4 = inlined_call_operand.vmem [shape: f32[1,128], index: 4, kind: input, shape index: {}]   ;;  %s2015_s5 = inlined_call_operand.vmem [shape: f32[32,128], index: 5, kind: output, shape index: {}]  }
   0x1 LB: > { %s1072_s19 = sadd.s32 4294967295, %s1800_s18   ;;  %p1074_p0 = scmp.ge.s32.totalorder %s1800_s18, 1  ;;  %s1800_s18 = sphi %s1842_s18, %s16_s18  }
   0x2   : > { %p157_p1 = scmp.lt.s32.totalorder %s1800_s18, 3  ;;  %s1802_s20 = smov [#allocation2]  }
   0x3   : > { %s169_s21 = sshll.u32 %s1802_s20, 4  ;;  %p1856_p3 = scmp.eq.s32.totalorder %s1072_s19, 0  ;;  %s170_s21 = int_to_ptr.vmem [resolvable:$true] %s169_s21 }
   0x4   : > { %p1850_p2 = pnand %p1074_p0, %p157_p1  ;;  %s1762_s27 = scalar_lea.hbm %s2011_s1, 12288 }
   0x5   : > { %s2020_s23 = scalar_select %p1856_p3, 1, 0 }
   0x6   : > { %s2019_s22 = scalar_select %p1850_p2, 1, 0 }
   0x7   : > { %p1720_p4 = pneg %p1850_p2  ;;  %p1763_p6 = scmp.ne.s32.totalorder %s2011_s1, %s1762_s27 }
   0x8   : > { %p1769_p10 = scmp.lt.u32.totalorder %s1762_s27, %s2011_s1 }
   0x9   : > { %p1864_p5 = pnand %p1856_p3, %p1720_p4 }
   0xb   : > { %p1764_p7 = pneg %p1864_p5 }
   0xd   : > { %p1765_p8 = pnand %p1764_p7, %p1763_p6 }
   0xf   : > { %p1766_p9 = pneg %p1765_p8 }
  0x11   : > { %p1771_p11 = pnand %p1769_p10, %p1766_p9 }
  0x13   : > { %1774 = shalt.err (!%p1771_p11)
}
  0x14   : > { %s1775_s7 = scalar_lea.vmem %s170_s21, 12288  ;;  %p1783_p1 = scmp.lt.s32.totalorder %s170_s21, %s170_s21 }
  0x15   : > { %p1776_p12 = scmp.ne.s32.totalorder %s170_s21, %s1775_s7  ;;  %p1784_p4 = scmp.lt.s32.totalorder %s1775_s7, %s1775_s7 }
  0x17   : > { %p1778_p13 = pnand %p1776_p12, %p1764_p7  ;;  %p1785_p3 = por %p1784_p4, %p1783_p1 }
  0x19   : > { %p1779_p0 = pneg %p1778_p13 }
  0x1b   : > { %p1786_p2 = pnand %p1785_p3, %p1779_p0 }
  0x1d   : > { %1789 = shalt.err (!%p1786_p2)
}
  0x1e   : > { %s1803_s8 = smov 128   ;;  %s1804_s9 = smov 8  }
  0x1f   : > { %1723 = dma.hbm_to_vmem [thread:$0]  (!%p1864_p5), %s2011_s1, 12288, %s170_s21, [#allocation3], %s1803_s8, %s1803_s8, %s1804_s9  }
  0x20   : > { %p2022_p6 = scmp.ne.s32.totalorder %s2019_s22, 0 }
  0x21   : > { %p2023_p8 = scmp.ne.s32.totalorder (!%p2022_p6), %s2020_s23, 0 }
  0x22   : > { %203 = sbr.rel (%p2022_p6) target bundleno = 1028 (0x404), region = 40 }
  0x29   : > { %1795 = dma.done.wait (%p2023_p8), [#allocation3], 12288  }
  0x2a   : > { %1797 = vsyncadd (%p2023_p8), [#allocation3], 4294955008  ;;  %s1079_s12 = sshll.u32 %s1072_s19, 1  ;;  %v1805_v0 = vmov 2   ;;  %v1806_v1 = vmov 3   ;;  %v465_v3 = vld [vmem:[#allocation2 + $0x100] sm:$0xff]  ;;  %v245_v62 = vlaneseq }
  0x2b   : > { %1744 = vset.pattern.permute.xlu0 %v1805_v0  ;;  %p232_p2 = scmp.lt.s32.totalorder %s1079_s12, 3  ;;  %1745 = vset.pattern.permute.xlu1 %v1806_v1  ;;  %v466_v4 = vld [vmem:[#allocation2 + $0x108] sm:$0xff]  ;;  %v467_v5 = vld [vmem:[#allocation2 + $0x110] sm:$0xff]  ;;  %v468_v6 = vld [vmem:[#allocation2 + $0x118] sm:$0xff]  ;;  %v1807_v18 = vmov 4   ;;  %v1808_v19 = vmov 1  }
  0x2c   : > { %v1546_v8 = vpack.c.bf16 %v466_v4, %v465_v3  ;;  %v1550_v9 = vpack.c.bf16 %v468_v6, %v467_v5  ;;  %v469_v10 = vld [vmem:[#allocation2 + $0x120] sm:$0xff]  ;;  %v470_v11 = vld [vmem:[#allocation2 + $0x128] sm:$0xff]  ;;  %v289_v15 = vld [vmem:[#allocation2 + $0x90] sm:$0xff]  ;;  %v1809_v33 = vmov 0   ;;  %v1810_v42 = vmov 5  }
  0x2d   : > { %s2025_s12 = smov (!%p232_p2, %s1079_s12), 3  ;;  %v287_v12 = vld [vmem:[#allocation2 + $0x80] sm:$0xff]  ;;  %v288_v13 = vld [vmem:[#allocation2 + $0x88] sm:$0xff]  ;;  %v290_v16 = vld [vmem:[#allocation2 + $0x98] sm:$0xff]  ;;  %v1554_v17 = vpack.c.bf16 %v470_v11, %v469_v10  ;;  %v1916_v63 = vand.u32 127, %v245_v62  ;;  %v1811_v4 = vmov 1.0  }
  0x2e   : > { %s1080_s13 = sshll.u32 %s2025_s12, 3  ;;  %1547 = vmatprep.subr.bf16.mxu0 %v1546_v8  ;;  %v1482_v14 = vpack.c.bf16 %v288_v13, %v287_v12  ;;  %v1486_v20 = vpack.c.bf16 %v290_v16, %v289_v15  ;;  %v471_v21 = vld [vmem:[#allocation2 + $0x130] sm:$0xff]  ;;  %v472_v22 = vld [vmem:[#allocation2 + $0x138] sm:$0xff]  ;;  %v291_v23 = vld [vmem:[#allocation2 + $0xa0] sm:$0xff] }
  0x2f   : > { %s235_s16 = scalar_lea.vmem %s2010_s0, %s1080_s13  ;;  %1549 = vmatpush3.bf16.msra.mxu0 %v1546_v8  ;;  %v292_v24 = vld [vmem:[#allocation2 + $0xa8] sm:$0xff]  ;;  %v1558_v25 = vpack.c.bf16 %v472_v22, %v471_v21  ;;  %v473_v27 = vld [vmem:[#allocation2 + $0x140] sm:$0xff]  ;;  %v293_v29 = vld [vmem:[#allocation2 + $0xb0] sm:$0xff]  ;;  %s241_s9 = scalar_lea.vmem %s2015_s5, %s1080_s13 }
  0x30   : > { %v1900_v2 = vld [vmem:[%s235_s16] sm:$0xff]  ;;  %v1904_v7 = vld [vmem:[%s235_s16 + $0x8] sm:$0xff]  ;;  %1551 = vmatprep.subr.bf16.mxu0 %v1550_v9  ;;  %1483 = vmatprep.subr.bf16.mxu1 %v1482_v14  ;;  %v1490_v26 = vpack.c.bf16 %v292_v24, %v291_v23  ;;  %v294_v30 = vld [vmem:[#allocation2 + $0xb8] sm:$0xff] }
  0x31   : > { %454 = vperm.xlu0 %1744, %v1900_v2   ;;  %559 = vperm.xlu1 %1745, %v1900_v2   ;;  %v474_v28 = vld [vmem:[#allocation2 + $0x148] sm:$0xff]  ;;  %v1494_v32 = vpack.c.bf16 %v294_v30, %v293_v29  ;;  %v475_v34 = vld [vmem:[#allocation2 + $0x150] sm:$0xff]  ;;  %v476_v35 = vld [vmem:[#allocation2 + $0x158] sm:$0xff] }
  0x32   : > { %1485 = vmatpush3.bf16.msra.mxu1 %v1482_v14  ;;  %v1562_v31 = vpack.c.bf16 %v474_v28, %v473_v27  ;;  %v295_v36 = vld [vmem:[#allocation2 + $0xc0] sm:$0xff]  ;;  %v296_v37 = vld [vmem:[#allocation2 + $0xc8] sm:$0xff]  ;;  %v1566_v38 = vpack.c.bf16 %v476_v35, %v475_v34  ;;  %v297_v43 = vld [vmem:[#allocation2 + $0xd0] sm:$0xff] }
  0x33   : > { %1553 = vmatpush3.bf16.msra.mxu0 %v1550_v9  ;;  %1487 = vmatprep.subr.bf16.mxu1 %v1486_v20  ;;  %v477_v39 = vld [vmem:[#allocation2 + $0x160] sm:$0xff]  ;;  %v478_v40 = vld [vmem:[#allocation2 + $0x168] sm:$0xff]  ;;  %v1498_v41 = vpack.c.bf16 %v296_v37, %v295_v36  ;;  %v298_v44 = vld [vmem:[#allocation2 + $0xd8] sm:$0xff] }
  0x34   : > { %1555 = vmatprep.subr.bf16.mxu0 %v1554_v17  ;;  %v1570_v45 = vpack.c.bf16 %v478_v40, %v477_v39  ;;  %v479_v46 = vld [vmem:[#allocation2 + $0x170] sm:$0xff]  ;;  %v480_v47 = vld [vmem:[#allocation2 + $0x178] sm:$0xff]  ;;  %v1502_v48 = vpack.c.bf16 %v298_v44, %v297_v43  ;;  %v299_v49 = vld [vmem:[#allocation2 + $0xe0] sm:$0xff] }
  0x35   : > { %457 = vperm.xlu0 %1744, %v1904_v7   ;;  %562 = vperm.xlu1 %1745, %v1904_v7   ;;  %v300_v50 = vld [vmem:[#allocation2 + $0xe8] sm:$0xff]  ;;  %v1574_v51 = vpack.c.bf16 %v480_v47, %v479_v46  ;;  %v570_v52 = vld [vmem:[#allocation2 + $0x180] sm:$0xff]  ;;  %v301_v55 = vld [vmem:[#allocation2 + $0xf0] sm:$0xff] }
  0x36   : > { %1489 = vmatpush3.bf16.msra.mxu1 %v1486_v20  ;;  %v571_v53 = vld [vmem:[#allocation2 + $0x188] sm:$0xff]  ;;  %v1506_v54 = vpack.c.bf16 %v300_v50, %v299_v49  ;;  %v302_v56 = vld [vmem:[#allocation2 + $0xf8] sm:$0xff]  ;;  %v259_v59 = vld [vmem:[#allocation2] sm:$0xff] }
  0x37   : > { %1557 = vmatpush3.bf16.msra.mxu0 %v1554_v17  ;;  %1491 = vmatprep.subr.bf16.mxu1 %v1490_v26  ;;  %v1578_v57 = vpack.c.bf16 %v571_v53, %v570_v52  ;;  %v1510_v58 = vpack.c.bf16 %v302_v56, %v301_v55  ;;  %v260_v60 = vld [vmem:[#allocation2 + $0x8] sm:$0xff]  ;;  %v573_v3 = vld [vmem:[#allocation2 + $0x198] sm:$0xff]  ;;  %v574_v8 = vld [vmem:[#allocation2 + $0x1a0] sm:$0xff] }
  0x38   : > { %1559 = vmatprep.subr.bf16.mxu0 %v1558_v25  ;;  %v1514_v61 = vpack.c.bf16 %v260_v60, %v259_v59  ;;  %v575_v9 = vld [vmem:[#allocation2 + $0x1a8] sm:$0xff]  ;;  %v576_v11 = vld [vmem:[#allocation2 + $0x1b0] sm:$0xff]  ;;  %v577_v12 = vld [vmem:[#allocation2 + $0x1b8] sm:$0xff] }
  0x39   : > { %1747 = vset.pattern.permute.xlu1 %v1807_v18  ;;  %1746 = vset.pattern.permute.xlu0 %v1808_v19  ;;  %v1586_v10 = vpack.c.bf16 %v575_v9, %v574_v8  ;;  %v261_v15 = vld [vmem:[#allocation2 + $0x10] sm:$0xff]  ;;  %v262_v16 = vld [vmem:[#allocation2 + $0x18] sm:$0xff]  ;;  %v1590_v17 = vpack.c.bf16 %v577_v12, %v576_v11  ;;  %v263_v22 = vld [vmem:[#allocation2 + $0x20] sm:$0xff] }
  0x3a   : > { %664 = vperm.xlu1 %1747, %v1900_v2   ;;  %276 = vperm.xlu0 %1746, %v1900_v2   ;;  %v1518_v21 = vpack.c.bf16 %v262_v16, %v261_v15  ;;  %v264_v23 = vld [vmem:[#allocation2 + $0x28] sm:$0xff]  ;;  %v265_v28 = vld [vmem:[#allocation2 + $0x30] sm:$0xff]  ;;  %v266_v29 = vld [vmem:[#allocation2 + $0x38] sm:$0xff] }
  0x3b   : > { %1561 = vmatpush3.bf16.msra.mxu0 %v1558_v25  ;;  %1493 = vmatpush3.bf16.msra.mxu1 %v1490_v26  ;;  %v580_v25 = vld [vmem:[#allocation2 + $0x1d0] sm:$0xff]  ;;  %v581_v26 = vld [vmem:[#allocation2 + $0x1d8] sm:$0xff]  ;;  %v1522_v27 = vpack.c.bf16 %v264_v23, %v263_v22  ;;  %v1526_v34 = vpack.c.bf16 %v266_v29, %v265_v28  ;;  %v267_v35 = vld [vmem:[#allocation2 + $0x40] sm:$0xff] }
  0x3c   : > { %1563 = vmatprep.subr.bf16.mxu0 %v1562_v31  ;;  %1495 = vmatprep.subr.bf16.mxu1 %v1494_v32  ;;  %v268_v36 = vld [vmem:[#allocation2 + $0x48] sm:$0xff]  ;;  %v585_v39 = vld [vmem:[#allocation2 + $0x1f8] sm:$0xff]  ;;  %v675_v44 = vld [vmem:[#allocation2 + $0x200] sm:$0xff] }
  0x3d   : > { %v1530_v40 = vpack.c.bf16 %v268_v36, %v267_v35  ;;  %v271_v47 = vld [vmem:[#allocation2 + $0x60] sm:$0xff]  ;;  %v677_v50 = vld [vmem:[#allocation2 + $0x210] sm:$0xff]  ;;  %v682_v62 = vld [vmem:[#allocation2 + $0x238] sm:$0xff] }
  0x3e   : > { %1748 = vset.pattern.permute.xlu1 %v1808_v19  ;;  %1749 = vset.pattern.permute.xlu0 %v1807_v18  ;;  %v578_v18 = vld [vmem:[#allocation2 + $0x1c0] sm:$0xff]  ;;  %v579_v19 = vld [vmem:[#allocation2 + $0x1c8] sm:$0xff]  ;;  %v273_v53 = vld [vmem:[#allocation2 + $0x70] sm:$0xff] }
  0x3f   : > { %279 = vperm.xlu1 %1748, %v1904_v7   ;;  %667 = vperm.xlu0 %1749, %v1904_v7   ;;  %v1594_v24 = vpack.c.bf16 %v579_v19, %v578_v18  ;;  %v687_v9 = vld [vmem:[#allocation2 + $0x260] sm:$0xff]  ;;  %v689_v12 = vld [vmem:[#allocation2 + $0x270] sm:$0xff]  ;;  %v781_v16 = vld [vmem:[#allocation2 + $0x288] sm:$0xff] }
  0x40   : > { %1565 = vmatpush3.bf16.msra.mxu0 %v1562_v31  ;;  %1497 = vmatpush3.bf16.msra.mxu1 %v1494_v32  ;;  %v1598_v31 = vpack.c.bf16 %v581_v26, %v580_v25  ;;  %v582_v32 = vld [vmem:[#allocation2 + $0x1e0] sm:$0xff]  ;;  %v782_v18 = vld [vmem:[#allocation2 + $0x290] sm:$0xff]  ;;  %v783_v19 = vld [vmem:[#allocation2 + $0x298] sm:$0xff] }
  0x41   : > { %1567 = vmatprep.subr.bf16.mxu0 %v1566_v38  ;;  %1499 = vmatprep.subr.bf16.mxu1 %v1498_v41  ;;  %v780_v15 = vld [vmem:[#allocation2 + $0x280] sm:$0xff]  ;;  %v785_v23 = vld [vmem:[#allocation2 + $0x2a8] sm:$0xff]  ;;  %v786_v25 = vld [vmem:[#allocation2 + $0x2b0] sm:$0xff] }
  0x42   : > { %v784_v22 = vld [vmem:[#allocation2 + $0x2a0] sm:$0xff]  ;;  %v787_v26 = vld [vmem:[#allocation2 + $0x2b8] sm:$0xff]  ;;  %v789_v29 = vld [vmem:[#allocation2 + $0x2c8] sm:$0xff] }
  0x43   : > { %1750 = vset.pattern.permute.xlu1 %v1809_v33  ;;  %1752 = vset.pattern.permute.xlu0 %v1809_v33  ;;  %v583_v33 = vld [vmem:[#allocation2 + $0x1e8] sm:$0xff]  ;;  %v788_v28 = vld [vmem:[#allocation2 + $0x2c0] sm:$0xff] }
  0x44   : > { %248 = vperm.xlu1 %1750, %v1900_v2   ;;  %251 = vperm.xlu0 %1752, %v1904_v7   ;;  %v1602_v37 = vpack.c.bf16 %v583_v33, %v582_v32  ;;  %v791_v32 = vld [vmem:[#allocation2 + $0x2d8] sm:$0xff]  ;;  %v793_v35 = vld [vmem:[#allocation2 + $0x2e8] sm:$0xff] }
  0x45   : > { %1569 = vmatpush3.bf16.msra.mxu0 %v1566_v38  ;;  %1501 = vmatpush3.bf16.msra.mxu1 %v1498_v41  ;;  %v584_v38 = vld [vmem:[#allocation2 + $0x1f0] sm:$0xff] }
  0x46   : > { %1571 = vmatprep.subr.bf16.mxu0 %v1570_v45  ;;  %1503 = vmatprep.subr.bf16.mxu1 %v1502_v48  ;;  %v269_v41 = vld [vmem:[#allocation2 + $0x50] sm:$0xff]  ;;  %v1606_v43 = vpack.c.bf16 %v585_v39, %v584_v38  ;;  %v795_v38 = vld [vmem:[#allocation2 + $0x2f8] sm:$0xff] }
  0x48   : > { %1751 = vset.pattern.permute.xlu1 %v1810_v42  ;;  %1753 = vset.pattern.permute.xlu0 %v1810_v42  ;;  %v270_v42 = vld [vmem:[#allocation2 + $0x58] sm:$0xff] }
  0x49   : > { %769 = vperm.xlu1 %1751, %v1900_v2   ;;  %1573 = vmatpush3.bf16.msra.mxu0 %v1570_v45  ;;  %v572_v2 = vld [vmem:[#allocation2 + $0x190] sm:$0xff]  ;;  %v676_v45 = vld [vmem:[#allocation2 + $0x208] sm:$0xff]  ;;  %v1534_v46 = vpack.c.bf16 %v270_v42, %v269_v41  ;;  %v884_v41 = vld [vmem:[%s2013_s3] sm:$0xff] }
  0x4a   : > { %1575 = vmatprep.subr.bf16.mxu0 %v1574_v51  ;;  %1505 = vmatpush3.bf16.msra.mxu1 %v1502_v48  ;;  %v1582_v6 = vpack.c.bf16 %v573_v3, %v572_v2  ;;  %v272_v48 = vld [vmem:[#allocation2 + $0x68] sm:$0xff]  ;;  %v1610_v49 = vpack.c.bf16 %v676_v45, %v675_v44  ;;  %v683_v2 = vld [vmem:[#allocation2 + $0x240] sm:$0xff]  ;;  %v887_v45 = vld [vmem:[%s2013_s3 + $0x18] sm:$0xff] }
  0x4b   : > { %1507 = vmatprep.subr.bf16.mxu1 %v1506_v54  ;;  %v1538_v52 = vpack.c.bf16 %v272_v48, %v271_v47  ;;  %v684_v3 = vld [vmem:[#allocation2 + $0x248] sm:$0xff]  ;;  %v890_v48 = vld [vmem:[%s2013_s3 + $0x30] sm:$0xff] }
  0x4c   : > { %v885_v42 = vld [vmem:[%s2013_s3 + $0x8] sm:$0xff] }
  0x4d   : > { %772 = vperm.xlu1 %1751, %v1904_v7   ;;  %1577 = vmatpush3.bf16.msra.mxu0 %v1574_v51  ;;  %v678_v51 = vld [vmem:[#allocation2 + $0x218] sm:$0xff]  ;;  %v1674_v44 = vpack.c.bf16 %v885_v42, %v884_v41 }
  0x4e   : > { %1579 = vmatprep.subr.bf16.mxu0 %v1578_v57  ;;  %1509 = vmatpush3.bf16.msra.mxu1 %v1506_v54  ;;  %v274_v54 = vld [vmem:[#allocation2 + $0x78] sm:$0xff]  ;;  %v1614_v55 = vpack.c.bf16 %v678_v51, %v677_v50  ;;  %v892_v51 = vld [vmem:[%s2013_s3 + $0x40] sm:$0xff] }
  0x4f   : > { %1511 = vmatprep.subr.bf16.mxu1 %v1510_v58  ;;  %v1542_v59 = vpack.c.bf16 %v274_v54, %v273_v53  ;;  %v894_v54 = vld [vmem:[%s2013_s3 + $0x50] sm:$0xff] }
  0x52   : > { %1513 = vmatpush3.bf16.msra.mxu1 %v1510_v58  ;;  %v680_v58 = vld [vmem:[#allocation2 + $0x228] sm:$0xff] }
  0x53   : > { %1515 = vmatprep.subr.bf16.mxu1 %v1514_v61 }
  0xb0   : > { %v455_v0 = vpop.permute.xlu0 %454  ;;  %v560_v1 = vpop.permute.xlu1 %559 }
  0xb1   : > { %vm459_vm0 = vcmp.eq.s32.totalorder %v1916_v63, %v455_v0  ;;  %vm564_vm1 = vcmp.eq.s32.totalorder %v1916_v63, %v560_v1 }
  0xb2   : > { %1339 = vmatprep.mubr.msk.f32.mxu0 %vm459_vm0, %v1811_v4 }
  0xb4   : > { %v458_v5 = vpop.permute.xlu0 %457  ;;  %v1921_v7 = vpop.permute.xlu1 %562 }
  0xb5   : > { %vm460_vm2 = vcmp.eq.s32.totalorder %v1916_v63, %v458_v5  ;;  %vm565_vm7 = vcmp.eq.s32.totalorder %v1916_v63, %v1921_v7  ;;  %v1626_v5 = vpack.c.bf16 %v684_v3, %v683_v2  ;;  %v686_v7 = vld [vmem:[#allocation2 + $0x258] sm:$0xff]  ;;  %v1107_v3 = vld [vmem:[%s2012_s2] ss:$0 sm:$0xff] }
  0xb6   : > { %1340 = vmatmul.mubr.msk.f32.vlgmr.msra.gmra.mrb[0].mxu0 %vm460_vm2, %v1811_v4 }
  0xb7   : > { %1581 = vmatpush3.bf16.msra.mxu0 %v1578_v57  ;;  %1374 = vmatprep.mubr.msk.f32.mxu0 %vm564_vm1, %v1811_v4  ;;  %v679_v57 = vld [vmem:[#allocation2 + $0x220] sm:$0xff] }
  0xb8   : > { %1583 = vmatprep.subr.bf16.mxu0 %v1582_v6  ;;  %v1618_v60 = vpack.c.bf16 %v680_v58, %v679_v57  ;;  %v896_v57 = vld [vmem:[%s2013_s3 + $0x60] sm:$0xff]  ;;  %v897_v58 = vld [vmem:[%s2013_s3 + $0x68] sm:$0xff] }
  0xb9   : > { %v1926_v13 = vpop.permute.xlu1 %664  ;;  %v277_v14 = vpop.permute.xlu0 %276 }
  0xba   : > { %vm281_vm3 = vcmp.eq.s32.totalorder %v1916_v63, %v277_v14  ;;  %vm669_vm6 = vcmp.eq.s32.totalorder %v1916_v63, %v1926_v13  ;;  %v690_v13 = vld [vmem:[#allocation2 + $0x278] sm:$0xff] }
  0xbb   : > { %1585 = vmatpush3.bf16.msra.mxu0 %v1582_v6  ;;  %1269 = vmatprep.mubr.msk.f32.mxu1 %vm281_vm3, %v1811_v4  ;;  %v685_v6 = vld [vmem:[#allocation2 + $0x250] sm:$0xff]  ;;  %v1638_v14 = vpack.c.bf16 %v690_v13, %v689_v12  ;;  %v1108_v12 = vld [vmem:[%s2014_s4] ss:$0 sm:$0xff] }
  0xbc   : > { %1587 = vmatprep.subr.bf16.mxu0 %v1586_v10  ;;  %v1630_v8 = vpack.c.bf16 %v686_v7, %v685_v6 }
  0xbe   : > { %v280_v20 = vpop.permute.xlu1 %279  ;;  %v668_v56 = vpop.permute.xlu0 %667 }
  0xbf   : > { %1589 = vmatpush3.bf16.msra.mxu0 %v1586_v10  ;;  %vm282_vm4 = vcmp.eq.s32.totalorder %v1916_v63, %v280_v20  ;;  %v688_v10 = vld [vmem:[#allocation2 + $0x268] sm:$0xff]  ;;  %vm670_vm9 = vcmp.eq.s32.totalorder %v1916_v63, %v668_v56 }
  0xc0   : > { %1591 = vmatprep.subr.bf16.mxu0 %v1590_v17  ;;  %1270 = vmatmul.mubr.msk.f32.vlgmr.msra.gmra.mrb[0].mxu1 %vm282_vm4, %v1811_v4  ;;  %v1634_v11 = vpack.c.bf16 %v688_v10, %v687_v9 }
  0xc1   : > { %1517 = vmatpush3.bf16.msra.mxu1 %v1514_v61  ;;  %v681_v61 = vld [vmem:[#allocation2 + $0x230] sm:$0xff] }
  0xc2   : > { %1519 = vmatprep.subr.bf16.mxu1 %v1518_v21  ;;  %v1622_v1 = vpack.c.bf16 %v682_v62, %v681_v61  ;;  %v899_v61 = vld [vmem:[%s2013_s3 + $0x78] sm:$0xff] }
  0xc3   : > { %1593 = vmatpush3.bf16.msra.mxu0 %v1590_v17  ;;  %v249_v30 = vpop.permute.xlu1 %248  ;;  %v252_v0 = vpop.permute.xlu0 %251  ;;  %v1642_v17 = vpack.c.bf16 %v781_v16, %v780_v15 }
  0xc4   : > { %1595 = vmatprep.subr.bf16.mxu0 %v1594_v24  ;;  %vm253_vm5 = vcmp.eq.s32.totalorder %v1916_v63, %v249_v30  ;;  %vm254_vm8 = vcmp.eq.s32.totalorder %v1916_v63, %v252_v0  ;;  %v1658_v30 = vpack.c.bf16 %v789_v29, %v788_v28 }
  0xc5   : > { %1521 = vmatpush3.bf16.msra.mxu1 %v1518_v21  ;;  %1304 = vmatprep.mubr.msk.f32.mxu1 %vm253_vm5, %v1811_v4  ;;  %v1646_v21 = vpack.c.bf16 %v783_v19, %v782_v18 }
  0xc6   : > { %1523 = vmatprep.subr.bf16.mxu1 %v1522_v27 }
  0xc7   : > { %1597 = vmatpush3.bf16.msra.mxu0 %v1594_v24  ;;  %v1650_v24 = vpack.c.bf16 %v785_v23, %v784_v22 }
  0xc8   : > { %1599 = vmatprep.subr.bf16.mxu0 %v1598_v31  ;;  %v770_v20 = vpop.permute.xlu1 %769 }
  0xc9   : > { %1525 = vmatpush3.bf16.msra.mxu1 %v1522_v27  ;;  %vm774_vm10 = vcmp.eq.s32.totalorder %v1916_v63, %v770_v20  ;;  %v1654_v27 = vpack.c.bf16 %v787_v26, %v786_v25 }
  0xca   : > { %1527 = vmatprep.subr.bf16.mxu1 %v1526_v34 }
  0xcb   : > { %1601 = vmatpush3.bf16.msra.mxu0 %v1598_v31  ;;  %v790_v31 = vld [vmem:[#allocation2 + $0x2d0] sm:$0xff] }
  0xcc   : > { %1603 = vmatprep.subr.bf16.mxu0 %v1602_v37  ;;  %v1662_v33 = vpack.c.bf16 %v791_v32, %v790_v31 }
  0xcd   : > { %1529 = vmatpush3.bf16.msra.mxu1 %v1526_v34  ;;  %v792_v34 = vld [vmem:[#allocation2 + $0x2e0] sm:$0xff] }
  0xce   : > { %1531 = vmatprep.subr.bf16.mxu1 %v1530_v40  ;;  %v1666_v36 = vpack.c.bf16 %v793_v35, %v792_v34 }
  0xcf   : > { %1605 = vmatpush3.bf16.msra.mxu0 %v1602_v37  ;;  %v794_v37 = vld [vmem:[#allocation2 + $0x2f0] sm:$0xff] }
  0xd0   : > { %1607 = vmatprep.subr.bf16.mxu0 %v1606_v43  ;;  %v1670_v39 = vpack.c.bf16 %v795_v38, %v794_v37 }
  0xd1   : > { %1533 = vmatpush3.bf16.msra.mxu1 %v1530_v40  ;;  %v773_v40 = vpop.permute.xlu1 %772 }
  0xd2   : > { %1535 = vmatprep.subr.bf16.mxu1 %v1534_v46  ;;  %vm775_vm11 = vcmp.eq.s32.totalorder %v1916_v63, %v773_v40 }
  0xd3   : > { %1609 = vmatpush3.bf16.msra.mxu0 %v1606_v43  ;;  %v886_v43 = vld [vmem:[%s2013_s3 + $0x10] sm:$0xff] }
  0xd4   : > { %1611 = vmatprep.subr.bf16.mxu0 %v1610_v49  ;;  %v1678_v63 = vpack.c.bf16 %v887_v45, %v886_v43 }
  0xd5   : > { %1537 = vmatpush3.bf16.msra.mxu1 %v1534_v46  ;;  %v889_v46 = vld [vmem:[%s2013_s3 + $0x28] sm:$0xff] }
  0xd6   : > { %1375 = vmatmul.mubr.msk.f32.vlgmr.msra.gmra.mrb[0].mxu0 %vm565_vm7, %v1811_v4  ;;  %1539 = vmatprep.subr.bf16.mxu1 %v1538_v52 }
  0xd7   : > { %1613 = vmatpush3.bf16.msra.mxu0 %v1610_v49  ;;  %1409 = vmatprep.mubr.msk.f32.mxu0 %vm669_vm6, %v1811_v4  ;;  %v891_v49 = vld [vmem:[%s2013_s3 + $0x38] sm:$0xff] }
  0xd8   : > { %1615 = vmatprep.subr.bf16.mxu0 %v1614_v55  ;;  %v1686_v50 = vpack.c.bf16 %v891_v49, %v890_v48 }
  0xd9   : > { %1541 = vmatpush3.bf16.msra.mxu1 %v1538_v52  ;;  %v893_v52 = vld [vmem:[%s2013_s3 + $0x48] sm:$0xff] }
  0xda   : > { %1543 = vmatprep.subr.bf16.mxu1 %v1542_v59  ;;  %v1690_v53 = vpack.c.bf16 %v893_v52, %v892_v51 }
  0xdb   : > { %1617 = vmatpush3.bf16.msra.mxu0 %v1614_v55  ;;  %v895_v55 = vld [vmem:[%s2013_s3 + $0x58] sm:$0xff] }
  0xdc   : > { %1619 = vmatprep.subr.bf16.mxu0 %v1618_v60  ;;  %v1694_v56 = vpack.c.bf16 %v895_v55, %v894_v54 }
  0xdd   : > { %1545 = vmatpush3.bf16.msra.mxu1 %v1542_v59  ;;  %v1698_v59 = vpack.c.bf16 %v897_v58, %v896_v57 }
  0xde   : > { %1675 = vmatprep.subr.bf16.mxu1 %v1674_v44 }
  0xdf   : > { %1621 = vmatpush3.bf16.msra.mxu0 %v1618_v60  ;;  %v898_v60 = vld [vmem:[%s2013_s3 + $0x70] sm:$0xff] }
  0xe0   : > { %1623 = vmatprep.subr.bf16.mxu0 %v1622_v1  ;;  %1305 = vmatmul.mubr.msk.f32.vlgmr.msra.gmra.mrb[0].mxu1 %vm254_vm8, %v1811_v4  ;;  %v1702_v62 = vpack.c.bf16 %v899_v61, %v898_v60 }
  0xe1   : > { %1677 = vmatpush3.bf16.msra.mxu1 %v1674_v44 }
  0xe2   : > { %1679 = vmatprep.subr.bf16.mxu1 %v1678_v63 }
  0xe3   : > { %1625 = vmatpush3.bf16.msra.mxu0 %v1622_v1 }
  0xe4   : > { %1627 = vmatprep.subr.bf16.mxu0 %v1626_v5 }
  0xe5   : > { %1681 = vmatpush3.bf16.msra.mxu1 %v1678_v63 }
  0xe7   : > { %1629 = vmatpush3.bf16.msra.mxu0 %v1626_v5 }
  0xe8   : > { %1631 = vmatprep.subr.bf16.mxu0 %v1630_v8 }
  0xeb   : > { %1633 = vmatpush3.bf16.msra.mxu0 %v1630_v8 }
  0xec   : > { %1635 = vmatprep.subr.bf16.mxu0 %v1634_v11 }
  0xef   : > { %1637 = vmatpush3.bf16.msra.mxu0 %v1634_v11 }
  0xf0   : > { %1639 = vmatprep.subr.bf16.mxu0 %v1638_v14 }
  0xf3   : > { %1641 = vmatpush3.bf16.msra.mxu0 %v1638_v14 }
  0xf4   : > { %1643 = vmatprep.subr.bf16.mxu0 %v1642_v17 }
  0xf6   : > { %1410 = vmatmul.mubr.msk.f32.vlgmr.msra.gmra.mrb[0].mxu0 %vm670_vm9, %v1811_v4 }
  0xf7   : > { %1645 = vmatpush3.bf16.msra.mxu0 %v1642_v17  ;;  %1444 = vmatprep.mubr.msk.f32.mxu0 %vm774_vm10, %v1811_v4 }
  0xf8   : > { %1647 = vmatprep.subr.bf16.mxu0 %v1646_v21 }
  0xfb   : > { %1649 = vmatpush3.bf16.msra.mxu0 %v1646_v21 }
  0xfc   : > { %1651 = vmatprep.subr.bf16.mxu0 %v1650_v24 }
  0xff   : > { %1653 = vmatpush3.bf16.msra.mxu0 %v1650_v24 }
 0x100   : > { %1655 = vmatprep.subr.bf16.mxu0 %v1654_v27 }
 0x103   : > { %1657 = vmatpush3.bf16.msra.mxu0 %v1654_v27 }
 0x104   : > { %1659 = vmatprep.subr.bf16.mxu0 %v1658_v30 }
 0x107   : > { %1661 = vmatpush3.bf16.msra.mxu0 %v1658_v30 }
 0x108   : > { %1663 = vmatprep.subr.bf16.mxu0 %v1662_v33 }
 0x10b   : > { %1665 = vmatpush3.bf16.msra.mxu0 %v1662_v33 }
 0x10c   : > { %1667 = vmatprep.subr.bf16.mxu0 %v1666_v36 }
 0x10f   : > { %1669 = vmatpush3.bf16.msra.mxu0 %v1666_v36 }
 0x110   : > { %1671 = vmatprep.subr.bf16.mxu0 %v1670_v39 }
 0x113   : > { %1673 = vmatpush3.bf16.msra.mxu0 %v1670_v39 }
 0x116   : > { %1445 = vmatmul.mubr.msk.f32.vlgmr.msra.gmra.mrb[0].mxu0 %vm775_vm11, %v1811_v4  ;;  %v888_v4 = vld [vmem:[%s2013_s3 + $0x20] sm:$0xff] }
 0x117   : > { %v1682_v47 = vpack.c.bf16 %v889_v46, %v888_v4 }
 0x119   : > { %1683 = vmatprep.subr.bf16.mxu1 %v1682_v47 }
 0x11a   : > { %1685 = vmatpush3.bf16.msra.mxu1 %v1682_v47 }
 0x11b   : > { %1687 = vmatprep.subr.bf16.mxu1 %v1686_v50 }
 0x11e   : > { %1689 = vmatpush3.bf16.msra.mxu1 %v1686_v50 }
 0x11f   : > { %1691 = vmatprep.subr.bf16.mxu1 %v1690_v53 }
 0x122   : > { %1693 = vmatpush3.bf16.msra.mxu1 %v1690_v53 }
 0x123   : > { %1695 = vmatprep.subr.bf16.mxu1 %v1694_v56 }
 0x126   : > { %1697 = vmatpush3.bf16.msra.mxu1 %v1694_v56 }
 0x127   : > { %1699 = vmatprep.subr.bf16.mxu1 %v1698_v59 }
 0x12a   : > { %1701 = vmatpush3.bf16.msra.mxu1 %v1698_v59 }
 0x12b   : > { %1703 = vmatprep.subr.bf16.mxu1 %v1702_v62 }
 0x12e   : > { %1705 = vmatpush3.bf16.msra.mxu1 %v1702_v62 }
 0x1b3   : > { %v1306_v0 = vpop.f32.mrb[0].mxu1 }
 0x1b4   : > { %v444_v1 = vpop.f32.mrb[1].mxu1 }
 0x1e9   : > { %v1446_v2 = vpop.f32.mrb[0].mxu0 }
 0x1ea   : > { %v1706_v5 = vadd.f32 %v1446_v2, %v1306_v0  ;;  %v862_v6 = vpop.f32.mrb[1].mxu0 }
 0x1eb   : > { %v1707_v7 = vadd.f32 %v862_v6, %v444_v1 }
 0x1ec   : > { %v881_v8 = vadd.f32 %v1706_v5, %v1107_v3 }
 0x1ed   : > { %v880_v9 = vadd.f32 %v1707_v7, %v1107_v3 }
 0x1ee   : > { %v883_v11 = vmax.f32 %v881_v8, 0.0 }
 0x1ef   : > { %v882_v10 = vmax.f32 %v880_v9, 0.0 }
 0x1f1   : > { %1479 = vmatprep.mubr.f32.mxu1 %v882_v10 }
 0x1f2   : > { %1480 = vmatmul.mubr.f32.vlgmr.msra.gmra.mrb[2].mxu1 %v883_v11 }
 0x2c5   : > { %v1481_v13 = vpop.f32.mrb[2].mxu1 }
 0x2c6   : > { %v979_v14 = vadd.f32 %v1481_v13, %v1108_v12  ;;  %v973_v15 = vpop.f32.mrb[3].mxu1 }
 0x2c7   : > { %v974_v16 = vadd.f32 %v1108_v12, %v973_v15 }
 0x2c8   : > { %984 = vmax.xlane.f32.xlu0 %v979_v14 }
 0x2c9   : > { %982 = vmax.xlane.f32.xlu1 %v974_v16 }
 0x355   : > { %v985_v17 = vpop.xlane.xlu0 %984 }
 0x356   : > { %v987_v18 = vsub.f32 %v979_v14, %v985_v17  ;;  %v983_v19 = vpop.xlane.xlu1 %982 }
 0x357   : > { %v986_v20 = vsub.f32 %v974_v16, %v983_v19 }
 0x358   : > { %v990_v21 = vmul.f32 1.442695, %v987_v18 }
 0x359   : > { %v988_v22 = vmul.f32 1.442695, %v986_v20 }
 0x35a   : > { %1754 = vpow2.f32 %v990_v21 }
 0x35b   : > { %1756 = vpow2.f32 %v988_v22 }
 0x364   : > { %v1755_v23 = vpop.eup %1754 }
 0x365   : > { %v1757_v24 = vpop.eup %1756  ;;  %994 = vadd.xlane.f32.xlu1 %v1755_v23 }
 0x366   : > { %992 = vadd.xlane.f32.xlu0 %v1757_v24 }
 0x3f2   : > { %v995_v25 = vpop.xlane.xlu1 %994 }
 0x3f3   : > { %1758 = vlog2.f32 %v995_v25  ;;  %v993_v26 = vpop.xlane.xlu0 %992 }
 0x3f4   : > { %1760 = vlog2.f32 %v993_v26 }
 0x3fd   : > { %v1759_v27 = vpop.eup %1758 }
 0x3fe   : > { %v1761_v28 = vpop.eup %1760  ;;  %v999_v29 = vmul.f32 0.6931472, %v1759_v27 }
 0x3ff   : > { %v997_v30 = vmul.f32 0.6931472, %v1761_v28 }
 0x400   : > { %v1001_v32 = vsub.f32 %v987_v18, %v999_v29 }
 0x401   : > { %v1000_v31 = vsub.f32 %v986_v20, %v997_v30 }
 0x402   : > { %1003 = vst [vmem:[%s241_s9 + $0x8] sm:$0xff] %v1001_v32 }
 0x403   : > { %1002 = vst [vmem:[%s241_s9] sm:$0xff] %v1000_v31 }
 0x404 PF: > { %s16_s18 = sadd.s32 1, %s1800_s18  }
 0x405   : > { %p13_p3 = scmp.ge.s32.totalorder %s16_s18, 4  }
 0x407   :  { %15 = sbr.rel (!%p13_p3) target bundleno = 1 (0x1), region = 75 }
 0x40e   :  { %1026 = vsyncpa [#allocation3], 1 }
 0x40f   :  { %1028 = vsyncpa [#allocation3 + $0x1], 1 }

</bundles_post_ra>
